<compile_context>
chip_gen: v7x
topology: tpu7x:2x2x1
jax: 0.10.0
libtpu: 0.0.40
codegen_flags: <defaults>
</compile_context>

<pallas_src>
import jax
import jax.numpy as jnp
from jax.experimental import pallas as pl
from jax.experimental.pallas import tpu as pltpu


LANES = 128


def _round_up(x, m):
    return ((x + m - 1) // m) * m


# -----------------------------------------------------------------------------
# Kernel
# -----------------------------------------------------------------------------
def proformer_kernel(x_ref, mask_ref, wqkv_ref, wcls_ref, bcls_ref, out_ref):
    """One batch tile: x_ref [TB, S, D] (bf16) -> out_ref [TB, C_pad] (f32)."""
    Dp = wqkv_ref.shape[1] // 3            # lane-aligned width of each q/k/v block

    x = x_ref[...]                                                 # [TB, S, D] bf16

    # ---- encoder (stand-in): single-head self-attention ----------------------
    # Fused QKV projection (1/sqrt(D) pre-folded into w_q). bf16 x bf16 -> f32.
    qkv = jnp.einsum('bsd,de->bse', x, wqkv_ref[...],
                     preferred_element_type=jnp.float32)           # [TB, S, 3*Dp]

    # Each block is Dp = round_up(D,128) lanes wide, so these slices land on
    # (8,128) tile boundaries and stay cheap views (no relayout / VMEM copies).
    q = qkv[:, :, :Dp].astype(jnp.bfloat16)
    k = qkv[:, :, Dp:2 * Dp].astype(jnp.bfloat16)
    v = qkv[:, :, 2 * Dp:]                                         # f32 for the PV step

    # scores[b,s,t] = q[b,s,:] . k[b,t,:]   (batched MXU matmul, Dp on lanes;
    # zero-padded lanes contribute exactly zero)
    scores = jnp.einsum('bsd,btd->bst', q, k,
                        preferred_element_type=jnp.float32)        # [TB, S, S]
    scores = scores + mask_ref[...].astype(jnp.float32)[None, :, :]

    # Softmax over keys in f32.  Approx EUP reciprocal (~1e-3-level relative
    # error on attention weights); switch to approx=False for bit-level parity.
    m = jnp.max(scores, axis=-1, keepdims=True)
    p = jnp.exp(scores - m)
    denom = jnp.sum(p, axis=-1, keepdims=True)
    attn = p * pl.reciprocal(denom, approx=True)

    # ---- cls_token_output = encoder_output.mean(dim=0) ------------------------
    # Only the mean over queries is consumed downstream, so reduce over the
    # query axis BEFORE the PV contraction (O(S*Dp) instead of O(S*S*Dp) per
    # batch row; the 1/S factor is folded into w_cls).  Expressed as a batched
    # (1 x S) @ (S x Dp) matmul so it runs on the MXU rather than as a
    # broadcast-multiply + sublane reduction.
    asum = jnp.sum(attn, axis=1)                                   # [TB, S]
    pooled = jnp.einsum('bqt,btd->bqd', asum[:, None, :], v,
                        preferred_element_type=jnp.float32)[:, 0, :]   # [TB, Dp]

    # ---- classification head (lane-dense padded output) -----------------------
    logits = jnp.dot(pooled, wcls_ref[...],
                     preferred_element_type=jnp.float32) + bcls_ref[...]
    out_ref[...] = logits.astype(out_ref.dtype)


# -----------------------------------------------------------------------------
# One-time weight preparation (hoisted out of the forward hot path)
# -----------------------------------------------------------------------------
def prepare_proformer_params(params, seq_len):
    """Scale fold, fused-QKV concat with 128-lane-aligned blocks, 1/S mean-pool
    fold into the classifier, lane-dense padding of the head.  Call once."""
    D = params['w_q'].shape[0]
    C = params['w_cls'].shape[1]
    Dp = _round_up(D, LANES)
    C_pad = _round_up(C, LANES)

    scale = 1.0 / jnp.sqrt(jnp.float32(D))

    def pad_lanes(w):                                  # [D, D] -> [D, Dp]
        return jnp.pad(w.astype(jnp.float32), ((0, 0), (0, Dp - D)))

    w_qkv = jnp.concatenate(
        [pad_lanes(params['w_q'] * scale),             # 1/sqrt(D) folded into w_q
         pad_lanes(params['w_k']),
         pad_lanes(params['w_v'])], axis=1).astype(jnp.bfloat16)    # [D, 3*Dp]

    # 1/S mean-pool factor folded in; rows padded to Dp (extra pooled lanes are
    # exactly zero), columns padded lane-dense to C_pad.
    w_cls = jnp.pad((params['w_cls'] / seq_len).astype(jnp.float32),
                    ((0, Dp - D), (0, C_pad - C)))                  # [Dp, C_pad]
    b_cls = jnp.pad(params['b_cls'].astype(jnp.float32).reshape(1, C),
                    ((0, 0), (0, C_pad - C)))                       # [1, C_pad]

    return dict(w_qkv=w_qkv, w_cls=w_cls, b_cls=b_cls,
                seq_len=seq_len, input_dim=D, num_classes=C,
                d_pad=Dp, c_pad=C_pad)


# -----------------------------------------------------------------------------
# Tile sizing / VMEM budgeting
# -----------------------------------------------------------------------------
def _vmem_bytes_estimate(tb, s, d, dp, c_pad, x_buffers):
    """Rough per-grid-step VMEM footprint (bytes)."""
    x_tile = tb * s * d * 2 * x_buffers          # bf16 x tile, pipelined
    qkv = tb * s * 3 * dp * 4                    # f32 QKV accumulator
    qk_bf16 = tb * s * 2 * dp * 2                # bf16 copies of q, k
    attn = 3 * tb * s * s * 4                    # scores / p / attn (f32)
    small = tb * (s + dp + c_pad) * 4            # asum / pooled / logits
    out_tile = tb * c_pad * 4 * 2                # f32 output tile, double-buffered
    resident = (s * s * 2                        # mask (bf16, single-buffered)
                + d * 3 * dp * 2                 # fused QKV weight (bf16)
                + dp * c_pad * 4 + c_pad * 4)    # classifier weight / bias (f32)
    return x_tile + qkv + qk_bf16 + attn + small + out_tile + resident


def _pick_batch_tile(b, s, d, dp, c_pad, x_buffers, vmem_budget):
    # MXU-occupancy target: >= 256 rows in the fused QKV matmul (v6e/v7x MXU).
    tb = _round_up(max(1, pl.cdiv(256, s)), 8)
    # Keep >= 2 grid steps once the batch allows it, so the "parallel" batch
    # axis can shard across both v7x TensorCores.
    tb = min(tb, _round_up(max(1, pl.cdiv(b, 2)), 8))
    tb = max(8, tb)
    # Shrink to the VMEM budget (v7x: 64 MiB physical; leave headroom).
    while tb > 8 and _vmem_bytes_estimate(tb, s, d, dp, c_pad, x_buffers) > vmem_budget:
        tb -= 8
    return tb


# -----------------------------------------------------------------------------
# Forward
# -----------------------------------------------------------------------------
def proformer_classifier(x, attn_mask, prepared, *, batch_tile=None,
                         x_batch_major=False, x_buffers=2):
    """ProformerClassifier.forward.

    x:          [S, B, D] (seq-first, as in the PyTorch module), or [B, S, D]
                with x_batch_major=True (drops the wrapper-side transpose).
    attn_mask:  additive [S, S] attention mask.
    prepared:   output of prepare_proformer_params (one-time weight prep).
    x_buffers:  pipeline depth for the x tile (raise to 3 on v5e if xprof
                shows exposed DMA).
    Returns [B, num_classes] float32 logits.
    """
    if x_batch_major:
        B, S, D = x.shape
        xb = x
    else:
        S, B, D = x.shape
        # TODO(synk): feed x batch-major upstream to drop this extra HBM pass.
        xb = jnp.transpose(x, (1, 0, 2))                            # [B, S, D]

    assert S == prepared['seq_len'] and D == prepared['input_dim']
    Dp, C, C_pad = prepared['d_pad'], prepared['num_classes'], prepared['c_pad']

    vmem_budget = 48 * 2**20                  # fits v7x's 64 MiB VMEM with headroom
    TB = batch_tile or _pick_batch_tile(B, S, D, Dp, C_pad, x_buffers, vmem_budget)
    # Guarantee >= 2 grid steps so both v7x TensorCores get work (no-op on
    # single-TC v5e/v6e; padded rows are dead weight only at tiny batch sizes).
    n_tiles = max(2, pl.cdiv(B, TB))
    B_pad = n_tiles * TB

    xb = xb.astype(jnp.bfloat16)              # bf16 MXU input, half the x DMA bytes
    if B_pad != B:
        xb = jnp.pad(xb, ((0, B_pad - B), (0, 0), (0, 0)))
    mask = attn_mask.astype(jnp.bfloat16)     # expanded to f32 in-kernel

    # TODO(synk): for very long sequences the [TB,S,S] softmax block outgrows
    #             VMEM even at TB=8; in that regime split the key axis with an
    #             online-softmax ("arbitrary") grid dimension (flash pattern).
    est = _vmem_bytes_estimate(TB, S, D, Dp, C_pad, x_buffers)
    vmem_limit = int(min(100 * 2**20, max(32 * 2**20, 2 * est)))

    out = pl.pallas_call(
        proformer_kernel,
        out_shape=jax.ShapeDtypeStruct((B_pad, C_pad), jnp.float32),
        grid=(n_tiles,),
        in_specs=[
            # per-batch x tile: pipelined behind compute
            pl.BlockSpec((TB, S, D), lambda i: (i, 0, 0),
                         pipeline_mode=pl.Buffered(x_buffers)),
            # constant-index_map operands: resident, single-buffered (no re-DMA,
            # half the VMEM vs the default double-buffering)
            pl.BlockSpec((S, S), lambda i: (0, 0),
                         pipeline_mode=pl.Buffered(1)),
            pl.BlockSpec((D, 3 * Dp), lambda i: (0, 0),
                         pipeline_mode=pl.Buffered(1)),
            pl.BlockSpec((Dp, C_pad), lambda i: (0, 0),
                         pipeline_mode=pl.Buffered(1)),
            pl.BlockSpec((1, C_pad), lambda i: (0, 0),
                         pipeline_mode=pl.Buffered(1)),
        ],
        out_specs=pl.BlockSpec((TB, C_pad), lambda i: (i, 0)),       # lane-dense
        compiler_params=pltpu.CompilerParams(
            dimension_semantics=("parallel",),    # shard batch tiles across TCs
            vmem_limit_bytes=vmem_limit),
    )(xb, mask, prepared['w_qkv'], prepared['w_cls'], prepared['b_cls'])

    return out[:B, :C]


# -----------------------------------------------------------------------------
# Pure-JAX reference (mirrors the PyTorch module with the stand-in encoder)
# -----------------------------------------------------------------------------
def reference(x, attn_mask, params):
    x = x.astype(jnp.float32)
    q = jnp.einsum('sbd,de->sbe', x, params['w_q'])
    k = jnp.einsum('sbd,de->sbe', x, params['w_k'])
    v = jnp.einsum('sbd,de->sbe', x, params['w_v'])
    scores = jnp.einsum('sbd,tbd->bst', q, k) / jnp.sqrt(jnp.float32(x.shape[-1]))
    scores = scores + attn_mask[None, :, :]
    attn = jax.nn.softmax(scores, axis=-1)
    enc = jnp.einsum('bst,tbd->sbd', attn, v)
    pooled = enc.mean(axis=0)
    return pooled @ params['w_cls'] + params['b_cls'][None, :]


if __name__ == "__main__":
    S, B, D, C = 8, 2, 32, 8          # seq, batch, input_dim, num_classes

    key = jax.random.PRNGKey(0)
    kx, kq, kk, kv, kc, kb = jax.random.split(key, 6)

    x = jax.random.normal(kx, (S, B, D), dtype=jnp.float32)

    # causal additive attention mask: 0 on/below diagonal, -1e9 above
    causal = jnp.tril(jnp.ones((S, S), dtype=jnp.float32))
    attn_mask = jnp.where(causal > 0, 0.0, -1e9).astype(jnp.float32)

    params = {
        'w_q':   0.02 * jax.random.normal(kq, (D, D), dtype=jnp.float32),
        'w_k':   0.02 * jax.random.normal(kk, (D, D), dtype=jnp.float32),
        'w_v':   0.02 * jax.random.normal(kv, (D, D), dtype=jnp.float32),
        # PyTorch Linear stores weight as [C, D]; we keep the transpose [D, C]
        'w_cls': 0.02 * jax.random.normal(kc, (D, C), dtype=jnp.float32),
        'b_cls': 0.01 * jax.random.normal(kb, (C,), dtype=jnp.float32),
    }

    prepared = prepare_proformer_params(params, seq_len=S)   # one-time, hoisted
    logits = jax.block_until_ready(proformer_classifier(x, attn_mask, prepared))
    ref = reference(x, attn_mask, params)

    assert logits.shape == (B, C)
    err = jnp.max(jnp.abs(logits - ref))
    assert jnp.allclose(logits, ref, atol=2e-3, rtol=2e-3), f"max err {err}"

    print("KERNEL_OK")
</pallas_src>

<mosaic_0001>
module attributes {stable_mosaic.version = 11 : i64} {
  func.func @proformer_kernel(%arg0: i32, %arg1: memref<8x8x32xbf16, #tpu.memory_space<vmem>>, %arg2: memref<8x8xbf16, #tpu.memory_space<vmem>>, %arg3: memref<32x384xbf16, #tpu.memory_space<vmem>>, %arg4: memref<128x128xf32, #tpu.memory_space<vmem>>, %arg5: memref<1x128xf32, #tpu.memory_space<vmem>>, %arg6: memref<8x128xf32, #tpu.memory_space<vmem>>) attributes {dimension_semantics = [#tpu.dimension_semantics<parallel>], iteration_bounds = array<i64: 2>, scalar_prefetch = 0 : i64, scratch_operands = 0 : i64, tpu.core_type = #tpu.core_type<tc>, window_params = [{pipeline_mode = #tpu.pipeline_mode<double_buffered>, transform_indices = @transform_0, window_bounds = array<i64: 8, 8, 32>}, {pipeline_mode = #tpu.pipeline_mode<synchronous>, transform_indices = @transform_1, window_bounds = array<i64: 8, 8>}, {pipeline_mode = #tpu.pipeline_mode<synchronous>, transform_indices = @transform_2, window_bounds = array<i64: 32, 384>}, {pipeline_mode = #tpu.pipeline_mode<synchronous>, transform_indices = @transform_3, window_bounds = array<i64: 128, 128>}, {pipeline_mode = #tpu.pipeline_mode<synchronous>, transform_indices = @transform_4, window_bounds = array<i64: 1, 128>}, {transform_indices = @transform_5, window_bounds = array<i64: 8, 128>}]} {
    %c0 = arith.constant 0 : index
    %c0_0 = arith.constant 0 : index
    %c0_1 = arith.constant 0 : index
    %0 = vector.load %arg1[%c0, %c0_0, %c0_1] : memref<8x8x32xbf16, #tpu.memory_space<vmem>>, vector<8x8x32xbf16>
    %c0_2 = arith.constant 0 : index
    %c0_3 = arith.constant 0 : index
    %1 = vector.load %arg3[%c0_2, %c0_3] : memref<32x384xbf16, #tpu.memory_space<vmem>>, vector<32x384xbf16>
    "tpu.trace_start"() <{level = 10 : i32, message = "bsd,de->bse"}> : () -> ()
    %cst = arith.constant dense<0.000000e+00> : vector<8x8x384xf32>
    %2 = tpu.matmul %0, %1, %cst {dimension_numbers = #tpu.dot_dimension_numbers<[2], [0], [0, 1], [1], [0, 0, 0, 1, 1, 1], [], []>} : vector<8x8x32xbf16>, vector<32x384xbf16>, vector<8x8x384xf32> -> vector<8x8x384xf32>
    "tpu.trace_stop"() : () -> ()
    %3 = vector.extract_strided_slice %2 {offsets = [0, 0, 0], sizes = [8, 8, 128], strides = [1, 1, 1]} : vector<8x8x384xf32> to vector<8x8x128xf32>
    %4 = arith.truncf %3 : vector<8x8x128xf32> to vector<8x8x128xbf16>
    %5 = vector.extract_strided_slice %2 {offsets = [0, 0, 128], sizes = [8, 8, 128], strides = [1, 1, 1]} : vector<8x8x384xf32> to vector<8x8x128xf32>
    %6 = arith.truncf %5 : vector<8x8x128xf32> to vector<8x8x128xbf16>
    %7 = vector.extract_strided_slice %2 {offsets = [0, 0, 256], sizes = [8, 8, 128], strides = [1, 1, 1]} : vector<8x8x384xf32> to vector<8x8x128xf32>
    "tpu.trace_start"() <{level = 10 : i32, message = "bsd,btd->bst"}> : () -> ()
    %cst_4 = arith.constant dense<0.000000e+00> : vector<8x8x8xf32>
    %8 = tpu.matmul %4, %6, %cst_4 {dimension_numbers = #tpu.dot_dimension_numbers<[2], [2], [1], [1], [0, 0, 0, 1, 1, 1], [0], [0]>} : vector<8x8x128xbf16>, vector<8x8x128xbf16>, vector<8x8x8xf32> -> vector<8x8x8xf32>
    "tpu.trace_stop"() : () -> ()
    %c0_5 = arith.constant 0 : index
    %c0_6 = arith.constant 0 : index
    %9 = vector.load %arg2[%c0_5, %c0_6] : memref<8x8xbf16, #tpu.memory_space<vmem>>, vector<8x8xbf16>
    %10 = arith.extf %9 : vector<8x8xbf16> to vector<8x8xf32>
    %11 = vector.shape_cast %10 : vector<8x8xf32> to vector<1x8x8xf32>
    %12 = vector.broadcast %11 : vector<1x8x8xf32> to vector<8x8x8xf32>
    %13 = arith.addf %8, %12 : vector<8x8x8xf32>
    %cst_7 = arith.constant dense<0xFF800000> : vector<8x8xf32>
    %14 = vector.multi_reduction <maximumf>, %13, %cst_7 [2] : vector<8x8x8xf32> to vector<8x8xf32>
    %15 = vector.shape_cast %14 : vector<8x8xf32> to vector<8x8x1xf32>
    %16 = vector.broadcast %15 : vector<8x8x1xf32> to vector<8x8x8xf32>
    %17 = arith.subf %13, %16 : vector<8x8x8xf32>
    %18 = math.exp %17 : vector<8x8x8xf32>
    %cst_8 = arith.constant dense<0.000000e+00> : vector<8x8xf32>
    %19 = vector.multi_reduction <add>, %18, %cst_8 [2] : vector<8x8x8xf32> to vector<8x8xf32>
    %20 = vector.shape_cast %19 : vector<8x8xf32> to vector<8x8x1xf32>
    %21 = tpu.reciprocal %20 {approx = true} : vector<8x8x1xf32> -> vector<8x8x1xf32>
    %22 = vector.broadcast %21 : vector<8x8x1xf32> to vector<8x8x8xf32>
    %23 = arith.mulf %18, %22 : vector<8x8x8xf32>
    %cst_9 = arith.constant dense<0.000000e+00> : vector<8x8xf32>
    %24 = vector.multi_reduction <add>, %23, %cst_9 [1] : vector<8x8x8xf32> to vector<8x8xf32>
    %25 = vector.shape_cast %24 : vector<8x8xf32> to vector<8x1x8xf32>
    "tpu.trace_start"() <{level = 10 : i32, message = "bqt,btd->bqd"}> : () -> ()
    %cst_10 = arith.constant dense<0.000000e+00> : vector<8x1x128xf32>
    %26 = tpu.matmul %25, %7, %cst_10 {dimension_numbers = #tpu.dot_dimension_numbers<[2], [1], [1], [2], [0, 0, 0, 1, 1, 2], [0], [0]>} : vector<8x1x8xf32>, vector<8x8x128xf32>, vector<8x1x128xf32> -> vector<8x1x128xf32>
    "tpu.trace_stop"() : () -> ()
    %27 = vector.shape_cast %26 : vector<8x1x128xf32> to vector<8x128xf32>
    %c0_11 = arith.constant 0 : index
    %c0_12 = arith.constant 0 : index
    %28 = vector.load %arg4[%c0_11, %c0_12] : memref<128x128xf32, #tpu.memory_space<vmem>>, vector<128x128xf32>
    %cst_13 = arith.constant dense<0.000000e+00> : vector<8x128xf32>
    %29 = tpu.matmul %27, %28, %cst_13 {dimension_numbers = #tpu.dot_dimension_numbers<[1], [0], [0], [1], [0, 0, 1, 1], [], []>} : vector<8x128xf32>, vector<128x128xf32>, vector<8x128xf32> -> vector<8x128xf32>
    %c0_14 = arith.constant 0 : index
    %c0_15 = arith.constant 0 : index
    %30 = vector.load %arg5[%c0_14, %c0_15] : memref<1x128xf32, #tpu.memory_space<vmem>>, vector<1x128xf32>
    %31 = vector.broadcast %30 : vector<1x128xf32> to vector<8x128xf32>
    %32 = arith.addf %29, %31 : vector<8x128xf32>
    %c0_16 = arith.constant 0 : index
    %c0_17 = arith.constant 0 : index
    %33 = vector.load %arg6[%c0_16, %c0_17] : memref<8x128xf32, #tpu.memory_space<vmem>>, vector<8x128xf32>
    tpu.vector_store %arg6[%c0_16, %c0_17], %32 {strides = array<i32>} : memref<8x128xf32, #tpu.memory_space<vmem>>, vector<8x128xf32>,
    return
  }
  func.func @transform_0(%arg0: i32) -> (i32, i32, i32) {
    %c0_i32 = arith.constant 0 : i32
    %c0_i32_0 = arith.constant 0 : i32
    %c0_i32_1 = arith.constant 0 : i32
    return %arg0, %c0_i32, %c0_i32_0 : i32, i32, i32
  }
  func.func @transform_1(%arg0: i32) -> (i32, i32) {
    %c0_i32 = arith.constant 0 : i32
    %c0_i32_0 = arith.constant 0 : i32
    %c0_i32_1 = arith.constant 0 : i32
    return %c0_i32, %c0_i32_0 : i32, i32
  }
  func.func @transform_2(%arg0: i32) -> (i32, i32) {
    %c0_i32 = arith.constant 0 : i32
    %c0_i32_0 = arith.constant 0 : i32
    %c0_i32_1 = arith.constant 0 : i32
    return %c0_i32, %c0_i32_0 : i32, i32
  }
  func.func @transform_3(%arg0: i32) -> (i32, i32) {
    %c0_i32 = arith.constant 0 : i32
    %c0_i32_0 = arith.constant 0 : i32
    %c0_i32_1 = arith.constant 0 : i32
    return %c0_i32, %c0_i32_0 : i32, i32
  }
  func.func @transform_4(%arg0: i32) -> (i32, i32) {
    %c0_i32 = arith.constant 0 : i32
    %c0_i32_0 = arith.constant 0 : i32
    %c0_i32_1 = arith.constant 0 : i32
    return %c0_i32, %c0_i32_0 : i32, i32
  }
  func.func @transform_5(%arg0: i32) -> (i32, i32) {
    %c0_i32 = arith.constant 0 : i32
    %c0_i32_0 = arith.constant 0 : i32
    return %arg0, %c0_i32 : i32, i32
  }
}

</mosaic_0001>

<bundles_post_ra>
// kernel: tpu_custom_call.1
= control target key start
LH: loop header
LB: loop body
LE: loop exit
PB: predicated region body
PF: predicated region fallthrough
CT: control target
= control target key end

     0   :  { %10 = vsyncpa [#allocation3], 0  ;;  %s2821_s0 = inlined_call_operand.hbm [shape: bf16[16,8,32], index: 0, kind: input, shape index: {}]   ;;  %s2822_s1 = inlined_call_operand.hbm [shape: bf16[8,8], index: 1, kind: input, shape index: {}]   ;;  %s2823_s2 = inlined_call_operand.hbm [shape: bf16[32,384], index: 2, kind: input, shape index: {}]   ;;  %s2824_s3 = inlined_call_operand.hbm [shape: f32[128,128], index: 3, kind: input, shape index: {}]   ;;  %s2825_s4 = inlined_call_operand.vmem [shape: f32[1,128], index: 4, kind: input, shape index: {}]   ;;  %s2826_s5 = inlined_call_operand.hbm [shape: f32[16,128], index: 5, kind: output, shape index: {}]  }
   0x1   :  { %12 = vsyncpa [#allocation3 + $0x1], 0 }
   0x2   :  { %13 = vsyncpa [#allocation6], 0 }
   0x3   :  { %14 = vsyncpa [#allocation9], 0 }
   0x4   :  { %15 = vsyncpa [#allocation4], 0 }
   0x5   :  { %17 = vsyncpa [#allocation4 + $0x1], 0  ;;  %s2441_s18 = smov 0   ;;  %s2443_s19 = smov 0  }
   0x6   :  { %s2445_s20 = smov 0   ;;  %s2447_s21 = smov 0  }
   0x7 LB: > { %s2462_s22 = sadd.s32 4294967295, %s2394_s21   ;;  %s1810_s23 = sadd.s32 4294967294, %s2394_s21   ;;  %s2394_s21 = sphi %s2447_s21, %s2849_s21   ;;  %s2390_s20 = sphi %s2445_s20, %s2848_s20   ;;  %s2386_s19 = sphi %s2443_s19, %s2847_s19   ;;  %s2382_s18 = sphi %s2441_s18, %s2846_s18  }
   0x8   : > { %p43_p0 = scmp.ne.s32.totalorder %s2386_s19, %s2382_s18  ;;  %p2827_p1 = scmp.eq.s32.totalorder %s2462_s22, 0 }
   0x9   : > { %p157_p3 = scmp.eq.s32.totalorder %s1810_s23, 1  ;;  %p1811_p5 = scmp.ge.s32.totalorder %s2394_s21, 1 }
   0xa   : > { %p2471_p4 = por %p2827_p1, %p43_p0  ;;  %p164_p7 = scmp.lt.s32.totalorder %s2394_s21, 3 }
   0xb   : > { %p2476_p6 = por %p157_p3, %p43_p0  ;;  %s2396_s27 = smov [#allocation5]  }
   0xc   : > { %s2830_s24 = scalar_select %p2471_p4, 1, 0 }
   0xd   : > { %s2831_s25 = scalar_select %p2476_p6, 1, 0 }
   0xe   : > { %p2481_p8 = pnand %p1811_p5, %p164_p7  ;;  %s177_s28 = sshll.u32 %s2396_s27, 4  ;;  %s178_s28 = int_to_ptr.vmem [resolvable:$true] %s177_s28 }
   0xf   : > { %s2397_s29 = smov [#allocation7]   ;;  %s2398_s7 = smov [#allocation8]  }
  0x10   : > { %s2832_s26 = scalar_select %p2481_p8, 1, 0 }
  0x11   : > { %p2091_p10 = pneg %p2481_p8  ;;  %s187_s30 = sshll.u32 %s2397_s29, 4  ;;  %s2494_s30 = int_to_ptr.vmem [resolvable:$true] %s187_s30 }
  0x12   : > { %s2496_s8 = sshll.u32 %s2398_s7, 4  ;;  %s2206_s11 = scalar_lea.hbm %s2822_s1, 64  ;;  %s201_s8 = int_to_ptr.vmem [resolvable:$true] %s2496_s8 }
  0x13   : > { %p2490_p11 = pnand %p2091_p10, %p2827_p1  ;;  %p2207_p12 = scmp.ne.s32.totalorder %s2822_s1, %s2206_s11 }
  0x14   : > { %p2213_p5 = scmp.lt.u32.totalorder %s2206_s11, %s2822_s1 }
  0x15   : > { %p2506_p13 = pneg %p2490_p11 }
  0x17   : > { %p2209_p0 = pnand %p2506_p13, %p2207_p12 }
  0x19   : > { %p2210_p3 = pneg %p2209_p0 }
  0x1b   : > { %p2215_p7 = pnand %p2213_p5, %p2210_p3 }
  0x1d   : > { %2218 = shalt.err (!%p2215_p7)
}
  0x1e   : > { %s2219_s17 = scalar_lea.vmem %s178_s28, 64  ;;  %p2227_p2 = scmp.lt.s32.totalorder %s178_s28, %s178_s28 }
  0x1f   : > { %p2220_p10 = scmp.ne.s32.totalorder %s178_s28, %s2219_s17  ;;  %p2228_p6 = scmp.lt.s32.totalorder %s2219_s17, %s2219_s17 }
  0x21   : > { %p2222_p9 = pnand %p2220_p10, %p2506_p13  ;;  %p2229_p4 = por %p2228_p6, %p2227_p2 }
  0x23   : > { %p2223_p1 = pneg %p2222_p9 }
  0x25   : > { %p2230_p8 = pnand %p2229_p4, %p2223_p1 }
  0x27   : > { %2233 = shalt.err (!%p2230_p8)
}
  0x28   : > { %2094 = dma.hbm_to_vmem [thread:$0]  (!%p2490_p11), %s2822_s1, 64, %s178_s28, [#allocation6]  }
  0x29   : > { %s2234_s9 = scalar_lea.hbm %s2823_s2, 768 }
  0x2a   : > { %p2235_p9 = scmp.ne.s32.totalorder %s2823_s2, %s2234_s9  ;;  %p2241_p1 = scmp.lt.u32.totalorder %s2234_s9, %s2823_s2 }
  0x2c   : > { %p2237_p12 = pnand %p2235_p9, %p2506_p13 }
  0x2e   : > { %p2238_p2 = pneg %p2237_p12 }
  0x30   : > { %p2243_p4 = pnand %p2241_p1, %p2238_p2 }
  0x32   : > { %2246 = shalt.err (!%p2243_p4)
}
  0x33   : > { %s2247_s28 = scalar_lea.vmem %s2494_s30, 768  ;;  %p2255_p3 = scmp.lt.s32.totalorder %s2494_s30, %s2494_s30 }
  0x34   : > { %p2248_p6 = scmp.ne.s32.totalorder %s2494_s30, %s2247_s28  ;;  %p2256_p5 = scmp.lt.s32.totalorder %s2247_s28, %s2247_s28 }
  0x36   : > { %p2250_p8 = pnand %p2248_p6, %p2506_p13  ;;  %p2257_p7 = por %p2256_p5, %p2255_p3 }
  0x38   : > { %p2251_p0 = pneg %p2250_p8 }
  0x3a   : > { %p2258_p10 = pnand %p2257_p7, %p2251_p0 }
  0x3c   : > { %2261 = shalt.err (!%p2258_p10)
}
  0x3d   : > { %s2399_s15 = smov 192   ;;  %s2400_s16 = smov 12  }
  0x3e   : > { %2097 = dma.hbm_to_vmem [thread:$0]  (!%p2490_p11), %s2823_s2, 768, %s2494_s30, [#allocation6], %s2399_s15, %s2399_s15, %s2400_s16  }
  0x3f   : > { %s2262_s7 = scalar_lea.hbm %s2824_s3, 2048 }
  0x40   : > { %p2263_p9 = scmp.ne.s32.totalorder %s2824_s3, %s2262_s7  ;;  %p2269_p1 = scmp.lt.u32.totalorder %s2262_s7, %s2824_s3 }
  0x42   : > { %p2265_p12 = pnand %p2263_p9, %p2506_p13 }
  0x44   : > { %p2266_p2 = pneg %p2265_p12 }
  0x46   : > { %p2271_p4 = pnand %p2269_p1, %p2266_p2 }
  0x48   : > { %2274 = shalt.err (!%p2271_p4)
}
  0x49   : > { %s2275_s13 = scalar_lea.vmem %s201_s8, 2048  ;;  %p2283_p3 = scmp.lt.s32.totalorder %s201_s8, %s201_s8 }
  0x4a   : > { %p2276_p6 = scmp.ne.s32.totalorder %s201_s8, %s2275_s13  ;;  %p2284_p5 = scmp.lt.s32.totalorder %s2275_s13, %s2275_s13 }
  0x4c   : > { %p2278_p8 = pnand %p2276_p6, %p2506_p13  ;;  %p2285_p7 = por %p2284_p5, %p2283_p3 }
  0x4e   : > { %p2279_p0 = pneg %p2278_p8 }
  0x50   : > { %p2286_p10 = pnand %p2285_p7, %p2279_p0 }
  0x52   : > { %2289 = shalt.err (!%p2286_p10)
}
  0x53   : > { %s2401_s30 = smov 128   ;;  %s2402_s14 = smov 8  }
  0x54   : > { %2100 = dma.hbm_to_vmem [thread:$0]  (!%p2490_p11), %s2824_s3, 2048, %s201_s8, [#allocation9], %s2401_s30, %s2401_s30, %s2402_s14  }
  0x55   : > { %s2565_s16 = sadd.s32 1, %s2394_s21   ;;  %s30_s23 = sadd.s32 1, %s2390_s20 }
  0x56   : > { %s27_s17 = ssub.s32 %s2394_s21, %s2565_s16  ;;  %p37_p9 = scmp.ne.s32.totalorder %s2390_s20, %s2386_s19 }
  0x57   : > { %p28_p13 = scmp.eq.s32.totalorder %s27_s17, 0  ;;  %p38_p12 = scmp.eq.s32.totalorder %s2394_s21, 0 }
  0x58   : > { %p2112_p2 = scmp.lt.s32.totalorder %s2394_s21, 2  ;;  %p2835_p4 = scmp.eq.s32.totalorder %s2462_s22, 1 }
  0x59   : > { %s2575_s27 = scalar_select %p28_p13, %s2390_s20, %s30_s23  }
  0x5a   : > { %p39_p1 = por %p38_p12, %p37_p9  ;;  %p2579_p6 = por %p2835_p4, %p37_p9 }
  0x5b   : > { %s217_s6 = sand.u32 1, %s2390_s20   ;;  %s1856_s7 = sshll.u32 %s2394_s21, 9 }
  0x5c   : > { %s1816_s8 = sshll.u32 %s217_s6, 5  ;;  %s2588_s11 = scalar_lea.hbm %s2821_s0, %s1856_s7 }
  0x5d   : > { %s221_s12 = scalar_lea.vmem [#allocation2], %s1816_s8  ;;  %p2590_p11 = pnand %p2112_p2, %p39_p1 }
  0x5e   : > { %s228_s13 = sshll.u32 %s221_s12, 4  ;;  %s2596_s14 = scalar_lea.sflag [#allocation3], %s217_s6  ;;  %s2594_s13 = int_to_ptr.vmem [resolvable:$true] %s228_s13 }
  0x5f   : > { %s2290_s28 = scalar_lea.hbm %s2588_s11, 512  ;;  %p2292_p0 = pneg %p2590_p11 }
  0x60   : > { %p2291_p8 = scmp.ne.s32.totalorder %s2588_s11, %s2290_s28  ;;  %s2295_s23 = scalar_lea.hbm %s2821_s0, 1024 }
  0x61   : > { %p2296_p7 = scmp.lt.u32.totalorder %s2588_s11, %s2821_s0  ;;  %p2297_p10 = scmp.lt.u32.totalorder %s2295_s23, %s2290_s28 }
  0x62   : > { %p2293_p3 = pnand %p2292_p0, %p2291_p8  ;;  %p2299_p9 = scmp.lt.u32.totalorder %s2290_s28, %s2588_s11 }
  0x63   : > { %p2298_p13 = por %p2297_p10, %p2296_p7 }
  0x64   : > { %p2294_p5 = pneg %p2293_p3 }
  0x65   : > { %p2300_p12 = por %p2299_p9, %p2298_p13 }
  0x67   : > { %p2301_p2 = pnand %p2300_p12, %p2294_p5 }
  0x69   : > { %2304 = shalt.err (!%p2301_p2)
}
  0x6a   : > { %s2305_s6 = scalar_lea.vmem %s2594_s13, 512  ;;  %s2403_s9 = smov [#allocation2]  }
  0x6b   : > { %p2306_p1 = scmp.ne.s32.totalorder %s2594_s13, %s2305_s6  ;;  %s2310_s10 = sshll.u32 %s2403_s9, 4  ;;  %s2311_s10 = int_to_ptr.vmem [resolvable:$false] %s2310_s10 }
  0x6c   : > { %s2312_s12 = scalar_lea.vmem %s2311_s10, 1024  ;;  %p2313_p3 = scmp.lt.s32.totalorder %s2594_s13, %s2311_s10 }
  0x6d   : > { %p2308_p4 = pnand %p2306_p1, %p2292_p0  ;;  %p2314_p7 = scmp.lt.s32.totalorder %s2312_s12, %s2305_s6 }
  0x6f   : > { %p2309_p8 = pneg %p2308_p4  ;;  %p2315_p10 = por %p2314_p7, %p2313_p3 }
  0x71   : > { %p2316_p13 = pnand %p2315_p10, %p2309_p8 }
  0x73   : > { %2319 = shalt.err (!%p2316_p13)
}
  0x74   : > { %s2404_s28 = smov 64   ;;  %s2405_s15 = smov 4  }
  0x75   : > { %2104 = dma.hbm_to_vmem [thread:$0]  (!%p2590_p11), %s2588_s11, 512, %s2594_s13, %s2596_s14, %s2404_s28, %s2404_s28, %s2405_s15  }
  0x76   : > { %p2838_p0 = scmp.ne.s32.totalorder %s2832_s26, 0 }
  0x77   : > { %s2627_s17 = sand.u32 (!%p2838_p0), 1, %s2386_s19   ;;  %p2839_p5 = scmp.ne.s32.totalorder (!%p2838_p0), %s2830_s24, 0 }
  0x78   : > { %240 = sbr.rel (%p2838_p0) target bundleno = 1383 (0x567), region = 40  ;;  %s1820_s23 = sshll.u32 (!%p2838_p0), %s2627_s17, 5 }
  0x79   : > { %s243_s7 = scalar_lea.sflag (!%p2838_p0), [#allocation3], %s2627_s17  ;;  %s2631_s8 = scalar_lea.vmem (!%p2838_p0), [#allocation2], %s1820_s23 }
  0x7f   : > { %2365 = dma.done.wait (%p2839_p5), %s243_s7, 512  }
  0x80   : > { %2367 = vsyncadd (%p2839_p5), %s243_s7, 4294966784  ;;  %p2840_p11 = scmp.eq.s32.totalorder %s2462_s22, 0 }
  0x82   : > { %2369 = dma.done.wait (%p2840_p11), [#allocation6], 832   ;;  %p2841_p9 = pmov %p2840_p11 }
  0x84   : > { %2371 = vsyncadd (%p2841_p9), [#allocation6], 4294966464  ;;  %p2842_p12 = pmov %p2841_p9 }
  0x85   : > { %p2843_p2 = pmov %p2841_p9 }
  0x86   : > { %2373 = dma.done.wait (%p2842_p12), [#allocation9], 2048  }
  0x87   : > { %2375 = vsyncadd (%p2843_p2), [#allocation9], 4294965248  ;;  %v2406_v0 = vmov 0   ;;  %v2162_v1 = vld [vmem:[#allocation7 + $0x4] ss:$12 sps:$4 sm:$0xff]   ;;  %v2168_v5 = vld [vmem:[%s2631_s8] sm:$0xff]  }
  0x88   : > { %400 = vmatprep.mubr.bf16.mxu0 %v2406_v0  ;;  %420 = vmatprep.mubr.bf16.mxu1 %v2406_v0  ;;  %v2164_v2 = vld [vmem:[#allocation7] ss:$12 sps:$4 sm:$0xff]   ;;  %v2165_v3 = vld [vmem:[#allocation7 + $0x1c] ss:$12 sps:$4 sm:$0xff]   ;;  %v2167_v4 = vld [vmem:[#allocation7 + $0x18] ss:$12 sps:$4 sm:$0xff]  }
  0x89   : > { %368 = vmatprep.subr.bf16.mxu0 %v2162_v1  ;;  %2071 = vmatprep.subr.bf16.mxu1 %v2162_v1  ;;  %vm355_vm0 = vcmask 261120   ;;  %v2170_v6 = vld [vmem:[%s2631_s8 + $0x10] sm:$0xff]   ;;  %v2172_v7 = vld [vmem:[#allocation7 + $0x8] ss:$12 sps:$4 sm:$0xff]   ;;  %v2407_v11 = vmov 0.0   ;;  %vm2408_vm1 = vmmov 0  }
  0x8a   : > { %369 = vmatpush1.bf16.msra.mxu0 %v2164_v2  ;;  %2073 = vmatpush1.bf16.msra.mxu1 %v2164_v2  ;;  %v2173_v8 = vld [vmem:[#allocation7 + $0x20] ss:$12 sps:$4 sm:$0xff]   ;;  %v2169_v9 = vld [vmem:[%s2631_s8 + $0x8] sm:$0xff]   ;;  %v2171_v10 = vld [vmem:[%s2631_s8 + $0x18] sm:$0xff]   ;;  %vm844_vm2 = vcmask 64512   ;;  %vm1605_vm3 = vcmask 1041409  }
  0x8b   : > { %370 = vmatprep.subr.bf16.mxu0 %v2165_v3  ;;  %2072 = vmatprep.subr.bf16.mxu1 %v2165_v3  ;;  %v522_v52 = vld [vmem:[#allocation5] sm:$0xf]  ;;  %vm1608_vm4 = vcmask 1042434   ;;  %vm1611_vm5 = vcmask 1043459   ;;  %vm1614_vm6 = vcmask 1044484   ;;  %vm1617_vm7 = vcmask 1045509  }
  0x8c   : > { %v523_v53 = vunpack.c.l.bf16 %v522_v52  ;;  %vm1620_vm8 = vcmask 1046534   ;;  %vm1623_vm9 = vcmask 1047559   ;;  %s1824_s24 = sshll.u32 %s2627_s17, 3  ;;  %s1853_s13 = sshll.u32 %s2462_s22, 7 }
  0x8d   : > { %s284_s30 = scalar_lea.vmem [#allocation10], %s1824_s24  ;;  %s2777_s10 = scalar_lea.hbm %s2826_s5, %s1853_s13 }
  0x8e   : > { %371 = vmatpush1.bf16.msra.mxu0 %v2167_v4  ;;  %2074 = vmatpush1.bf16.msra.mxu1 %v2167_v4  ;;  %s1711_s14 = sshll.u32 %s284_s30, 4  ;;  %s1698_s12 = scalar_lea.sflag [#allocation4], %s2627_s17  ;;  %s2779_s14 = int_to_ptr.vmem [resolvable:$true] %s1711_s14 }
  0x8f   : > { %1912 = vmatprep.subr.bf16.mxu1 %v2172_v7  ;;  %1936 = vmatprep.subr.bf16.mxu0 %v2407_v11  ;;  %s2320_s28 = scalar_lea.vmem %s2779_s14, 128  ;;  %s2410_s22 = smov [#allocation10]  }
  0x90   : > { %p2321_p1 = scmp.ne.s32.totalorder %s2779_s14, %s2320_s28  ;;  %s2324_s15 = sshll.u32 %s2410_s22, 4  ;;  %s2325_s15 = int_to_ptr.vmem [resolvable:$false] %s2324_s15 }
  0x91   : > { %1835 = vmatmul.mubr.msk.bf16.vlgmr.msra.gmra.mrb[0].mxu0 %vm355_vm0, %v2168_v5  ;;  %1837 = vmatmul.mubr.msk.bf16.vlgmr.msra.gmra.mrb[0].mxu1 %vm355_vm0, %v2170_v6  ;;  %s2326_s23 = scalar_lea.vmem %s2325_s15, 256  ;;  %p2327_p3 = scmp.lt.s32.totalorder %s2779_s14, %s2325_s15 }
  0x92   : > { %410 = vmatprep.mubr.bf16.mxu0 %v2406_v0  ;;  %430 = vmatprep.mubr.bf16.mxu1 %v2406_v0  ;;  %p2322_p4 = pnand %p2321_p1, %p2579_p6  ;;  %p2328_p7 = scmp.lt.s32.totalorder %s2326_s23, %s2320_s28 }
  0x93   : > { %1913 = vmatpush3.bf16.msra.mxu1 %v2172_v7 }
  0x94   : > { %1914 = vmatprep.subr.bf16.mxu1 %v2173_v8  ;;  %p2323_p8 = pneg %p2322_p4  ;;  %p2329_p10 = por %p2328_p7, %p2327_p3 }
  0x96   : > { %p2330_p13 = pnand %p2329_p10, %p2323_p8 }
  0x97   : > { %1915 = vmatpush3.bf16.msra.mxu1 %v2173_v8 }
  0x98   : > { %1924 = vmatprep.subr.bf16.mxu1 %v2407_v11 }
  0x99   : > { %1836 = vmatmul.mubr.msk.bf16.gmra.mrb[4].mxu0 %vm355_vm0, %v2169_v9  ;;  %1838 = vmatmul.mubr.msk.bf16.gmra.mrb[4].mxu1 %vm355_vm0, %v2171_v10 }
  0x9a   : > { %1916 = vmatprep.mubr.msk.bf16.mxu1 %vm355_vm0, %v2168_v5  ;;  %1938 = vmatprep.mubr.msk.bf16.mxu0 %vm2408_vm1, %v2407_v11 }
  0xa1   : > { %1917 = vmatmul.mubr.msk.bf16.vlgmr.msra.gmra.mrb[8].mxu1 %vm355_vm0, %v2169_v9 }
  0xa2   : > { %1920 = vmatprep.mubr.msk.bf16.mxu1 %vm355_vm0, %v2170_v6 }
  0xa9   : > { %1921 = vmatmul.mubr.msk.bf16.gmra.mrb[12].mxu1 %vm355_vm0, %v2171_v10 }
  0xaa   : > { %1926 = vmatprep.mubr.msk.bf16.mxu1 %vm2408_vm1, %v2407_v11 }
 0x164   : > { %v402_v12 = vpop.f32.mrb[0].mxu0  ;;  %v422_v13 = vpop.f32.mrb[0].mxu1 }
 0x165   : > { %v404_v14 = vpop.f32.mrb[1].mxu0  ;;  %v424_v15 = vpop.f32.mrb[1].mxu1  ;;  %v506_v23 = vpack.c.bf16 %v402_v12, %v402_v12  ;;  %v510_v43 = vpack.c.bf16 %v422_v13, %v422_v13 }
 0x166   : > { %v514_v16 = vpack.c.bf16 %v404_v14, %v404_v14  ;;  %v406_v17 = vpop.f32.mrb[2].mxu0  ;;  %v426_v18 = vpop.f32.mrb[2].mxu1  ;;  %v518_v32 = vpack.c.bf16 %v424_v15, %v424_v15 }
 0x167   : > { %v408_v19 = vpop.f32.mrb[3].mxu0  ;;  %v428_v20 = vpop.f32.mrb[3].mxu1  ;;  %v507_v34 = vpack.c.bf16 %v406_v17, %v406_v17  ;;  %v511_v48 = vpack.c.bf16 %v426_v18, %v426_v18 }
 0x168   : > { %1925 = vmatpush3.bf16.xpose.msra.mxu1 %v514_v16  ;;  %v515_v26 = vpack.c.bf16 %v408_v19, %v408_v19  ;;  %v519_v45 = vpack.c.bf16 %v428_v20, %v428_v20 }
 0x169   : > { %1930 = vmatprep.subr.bf16.mxu1 %v2407_v11 }
 0x16c   : > { %v412_v21 = vpop.f32.mrb[4].mxu0  ;;  %v432_v22 = vpop.f32.mrb[4].mxu1 }
 0x16d   : > { %v414_v24 = vpop.f32.mrb[5].mxu0  ;;  %v434_v25 = vpop.f32.mrb[5].mxu1  ;;  %v508_v35 = vpack.c.bf16 %v412_v21, %v412_v21  ;;  %v512_v49 = vpack.c.bf16 %v432_v22, %v432_v22 }
 0x16e   : > { %v516_v27 = vpack.c.bf16 %v414_v24, %v414_v24  ;;  %v416_v28 = vpop.f32.mrb[6].mxu0  ;;  %v436_v29 = vpop.f32.mrb[6].mxu1  ;;  %v520_v40 = vpack.c.bf16 %v434_v25, %v434_v25 }
 0x16f   : > { %1927 = vmatmul.mubr.bf16.vlgmr.msra.gmra.mrb[16].mxu1 %v506_v23  ;;  %v418_v30 = vpop.f32.mrb[7].mxu0  ;;  %v438_v31 = vpop.f32.mrb[7].mxu1  ;;  %v509_v42 = vpack.c.bf16 %v416_v28, %v416_v28  ;;  %v513_v51 = vpack.c.bf16 %v436_v29, %v436_v29 }
 0x170   : > { %1931 = vmatpush3.bf16.xpose.msra.mxu1 %v515_v26  ;;  %1937 = vmatpush3.bf16.xpose.msra.mxu0 %v516_v27  ;;  %v517_v37 = vpack.c.bf16 %v418_v30, %v418_v30  ;;  %v521_v50 = vpack.c.bf16 %v438_v31, %v438_v31 }
 0x171   : > { %1932 = vmatprep.mubr.msk.bf16.mxu1 %vm2408_vm1, %v2407_v11  ;;  %1942 = vmatprep.subr.bf16.mxu1 %v2407_v11 }
 0x172   : > { %1948 = vmatprep.subr.bf16.mxu0 %v2407_v11 }
 0x174   : > { %v2668_v33 = vpop.f32.mrb[8].mxu1 }
 0x175   : > { %v475_v36 = vpop.f32.mrb[9].mxu1 }
 0x176   : > { %v2670_v38 = vpop.f32.mrb[10].mxu1 }
 0x177   : > { %1933 = vmatmul.mubr.bf16.vlgmr.msra.gmra.mrb[20].mxu1 %v507_v34  ;;  %1939 = vmatmul.mubr.bf16.vlgmr.msra.gmra.mrb[8].mxu0 %v508_v35  ;;  %v478_v39 = vpop.f32.mrb[11].mxu1 }
 0x178   : > { %1943 = vmatpush3.bf16.xpose.msra.mxu1 %v517_v37  ;;  %1949 = vmatpush3.bf16.xpose.msra.mxu0 %v518_v32 }
 0x179   : > { %1944 = vmatprep.mubr.msk.bf16.mxu1 %vm2408_vm1, %v2407_v11  ;;  %1950 = vmatprep.mubr.msk.bf16.mxu0 %vm2408_vm1, %v2407_v11 }
 0x17a   : > { %1954 = vmatprep.subr.bf16.mxu1 %v2407_v11  ;;  %1960 = vmatprep.subr.bf16.mxu0 %v2407_v11 }
 0x17c   : > { %v2678_v41 = vpop.f32.mrb[12].mxu1 }
 0x17d   : > { %v2680_v44 = vpop.f32.mrb[13].mxu1 }
 0x17e   : > { %v2682_v46 = vpop.f32.mrb[14].mxu1 }
 0x17f   : > { %1945 = vmatmul.mubr.bf16.vlgmr.msra.gmra.mrb[24].mxu1 %v509_v42  ;;  %1951 = vmatmul.mubr.bf16.vlgmr.msra.gmra.mrb[12].mxu0 %v510_v43  ;;  %v2684_v47 = vpop.f32.mrb[15].mxu1 }
 0x180   : > { %1955 = vmatpush3.bf16.xpose.msra.mxu1 %v519_v45  ;;  %1961 = vmatpush3.bf16.xpose.msra.mxu0 %v520_v40 }
 0x181   : > { %1956 = vmatprep.mubr.msk.bf16.mxu1 %vm2408_vm1, %v2407_v11  ;;  %1962 = vmatprep.mubr.msk.bf16.mxu0 %vm2408_vm1, %v2407_v11 }
 0x182   : > { %1966 = vmatprep.subr.bf16.mxu1 %v2407_v11  ;;  %1972 = vmatprep.subr.mxu0 %v2407_v11 }
 0x187   : > { %1957 = vmatmul.mubr.bf16.vlgmr.msra.gmra.mrb[28].mxu1 %v511_v48  ;;  %1963 = vmatmul.mubr.bf16.vlgmr.msra.gmra.mrb[16].mxu0 %v512_v49 }
 0x188   : > { %1967 = vmatpush3.bf16.xpose.msra.mxu1 %v521_v50  ;;  %1968 = vmatprep.mubr.msk.bf16.mxu1 %vm2408_vm1, %v2407_v11 }
 0x189   : > { %1977 = vmatprep.subr.mxu1 %v2407_v11  ;;  %1973 = vmatpush3.msra.mxu0 %v475_v36 }
 0x18a   : > { %1974 = vmatprep.mubr.msk.f32.mxu0 %vm2408_vm1, %v2407_v11  ;;  %1982 = vmatprep.subr.mxu0 %v2407_v11 }
 0x18f   : > { %1969 = vmatmul.mubr.bf16.vlgmr.msra.gmra.mrb[32].mxu1 %v513_v51 }
 0x190   : > { %1978 = vmatpush3.msra.mxu1 %v478_v39  ;;  %1979 = vmatprep.mubr.msk.f32.mxu1 %vm2408_vm1, %v2407_v11 }
 0x191   : > { %1987 = vmatprep.subr.mxu1 %v2407_v11 }
 0x242   : > { %v558_v54 = vpop.f32.mrb[16].mxu1 }
 0x243   : > { %v559_v55 = vadd.f32 %v558_v54, %v523_v53  ;;  %v1928_v56 = vpop.f32.mrb[17].mxu1 }
 0x244   : > { %v561_v57 = vpop.f32.mrb[18].mxu1 }
 0x245   : > { %v1929_v58 = vpop.f32.mrb[19].mxu1  ;;  %v845_v59 = vsel %vm844_vm2, %v559_v55, -inf }
 0x246   : > { %846 = vmax.xlane.f32.xlu0 %v845_v59 }
 0x24a   : > { %v598_v60 = vpop.f32.mrb[20].mxu1  ;;  %v638_v61 = vpop.f32.mrb[8].mxu0 }
 0x24b   : > { %v599_v62 = vadd.f32 %v598_v60, %v523_v53  ;;  %v639_v63 = vadd.f32 %v638_v61, %v523_v53  ;;  %v1934_v0 = vpop.f32.mrb[21].mxu1  ;;  %v1940_v1 = vpop.f32.mrb[9].mxu0 }
 0x24c   : > { %v601_v2 = vpop.f32.mrb[22].mxu1  ;;  %v641_v3 = vpop.f32.mrb[10].mxu0 }
 0x24d   : > { %v1935_v4 = vpop.f32.mrb[23].mxu1  ;;  %v1941_v5 = vpop.f32.mrb[11].mxu0  ;;  %v848_v6 = vsel %vm844_vm2, %v599_v62, -inf  ;;  %v851_v7 = vsel %vm844_vm2, %v639_v63, -inf }
 0x24e   : > { %849 = vmax.xlane.f32.xlu0 %v848_v6  ;;  %852 = vmax.xlane.f32.xlu1 %v851_v7 }
 0x252   : > { %v678_v8 = vpop.f32.mrb[24].mxu1  ;;  %v718_v9 = vpop.f32.mrb[12].mxu0 }
 0x253   : > { %v679_v10 = vadd.f32 %v678_v8, %v523_v53  ;;  %v719_v12 = vadd.f32 %v718_v9, %v523_v53  ;;  %v1946_v13 = vpop.f32.mrb[25].mxu1  ;;  %v1952_v14 = vpop.f32.mrb[13].mxu0 }
 0x254   : > { %v681_v15 = vpop.f32.mrb[26].mxu1  ;;  %v721_v16 = vpop.f32.mrb[14].mxu0 }
 0x255   : > { %v1947_v17 = vpop.f32.mrb[27].mxu1  ;;  %v857_v18 = vsel %vm844_vm2, %v719_v12, -inf  ;;  %v854_v19 = vsel %vm844_vm2, %v679_v10, -inf  ;;  %v1953_v20 = vpop.f32.mrb[15].mxu0 }
 0x256   : > { %858 = vmax.xlane.f32.xlu0 %v857_v18  ;;  %855 = vmax.xlane.f32.xlu1 %v854_v19 }
 0x25a   : > { %v758_v21 = vpop.f32.mrb[28].mxu1  ;;  %v798_v22 = vpop.f32.mrb[16].mxu0 }
 0x25b   : > { %v759_v23 = vadd.f32 %v758_v21, %v523_v53  ;;  %v799_v24 = vadd.f32 %v798_v22, %v523_v53  ;;  %v1958_v25 = vpop.f32.mrb[29].mxu1  ;;  %v1964_v26 = vpop.f32.mrb[17].mxu0 }
 0x25c   : > { %v761_v27 = vpop.f32.mrb[30].mxu1  ;;  %v801_v28 = vpop.f32.mrb[18].mxu0 }
 0x25d   : > { %v1959_v29 = vpop.f32.mrb[31].mxu1  ;;  %v863_v30 = vsel %vm844_vm2, %v799_v24, -inf  ;;  %v860_v31 = vsel %vm844_vm2, %v759_v23, -inf  ;;  %v1965_v32 = vpop.f32.mrb[19].mxu0 }
 0x25e   : > { %864 = vmax.xlane.f32.xlu0 %v863_v30  ;;  %861 = vmax.xlane.f32.xlu1 %v860_v31 }
 0x262   : > { %v838_v34 = vpop.f32.mrb[32].mxu1 }
 0x263   : > { %v839_v35 = vadd.f32 %v838_v34, %v523_v53  ;;  %v1970_v36 = vpop.f32.mrb[33].mxu1 }
 0x264   : > { %v841_v37 = vpop.f32.mrb[34].mxu1 }
 0x265   : > { %v1971_v39 = vpop.f32.mrb[35].mxu1  ;;  %v866_v40 = vsel %vm844_vm2, %v839_v35, -inf }
 0x266   : > { %867 = vmax.xlane.f32.xlu1 %v866_v40 }
 0x2d3   : > { %v847_v42 = vpop.xlane.xlu0 %846 }
 0x2d4   : > { %v869_v43 = vsub.f32 %v559_v55, %v847_v42 }
 0x2d6   : > { %v877_v45 = vmul.f32 1.442695, %v869_v43 }
 0x2d8   : > { %2174 = vpow2.f32 %v877_v45 }
 0x2db   : > { %v850_v48 = vpop.xlane.xlu0 %849  ;;  %v853_v49 = vpop.xlane.xlu1 %852 }
 0x2dc   : > { %v870_v50 = vsub.f32 %v599_v62, %v850_v48  ;;  %v871_v51 = vsub.f32 %v639_v63, %v853_v49 }
 0x2de   : > { %v879_v52 = vmul.f32 1.442695, %v870_v50  ;;  %v881_v54 = vmul.f32 1.442695, %v871_v51 }
 0x2e0   : > { %2176 = vpow2.f32 %v879_v52 }
 0x2e1   : > { %2178 = vpow2.f32 %v881_v54 }
 0x2e2   : > { %v2175_v56 = vpop.eup %2174 }
 0x2e3   : > { %v859_v53 = vpop.xlane.xlu0 %858  ;;  %v856_v57 = vpop.xlane.xlu1 %855  ;;  %v893_v58 = vsel %vm844_vm2, %v2175_v56, 0.0 }
 0x2e4   : > { %v873_v59 = vsub.f32 %v719_v12, %v859_v53  ;;  %v872_v60 = vsub.f32 %v679_v10, %v856_v57  ;;  %894 = vadd.xlane.f32.xlu0 %v893_v58 }
 0x2e6   : > { %v885_v61 = vmul.f32 1.442695, %v873_v59  ;;  %v883_v55 = vmul.f32 1.442695, %v872_v60 }
 0x2e8   : > { %2180 = vpow2.f32 %v885_v61 }
 0x2e9   : > { %2182 = vpow2.f32 %v883_v55 }
 0x2ea   : > { %v2177_v0 = vpop.eup %2176 }
 0x2eb   : > { %v2179_v1 = vpop.eup %2178  ;;  %v865_v62 = vpop.xlane.xlu0 %864  ;;  %v896_v2 = vsel %vm844_vm2, %v2177_v0, 0.0 }
 0x2ec   : > { %v862_v63 = vpop.xlane.xlu1 %861  ;;  %v875_v3 = vsub.f32 %v799_v24, %v865_v62  ;;  %v899_v5 = vsel %vm844_vm2, %v2179_v1, 0.0  ;;  %897 = vadd.xlane.f32.xlu1 %v896_v2 }
 0x2ed   : > { %v874_v4 = vsub.f32 %v759_v23, %v862_v63  ;;  %900 = vadd.xlane.f32.xlu0 %v899_v5 }
 0x2ee   : > { %v889_v6 = vmul.f32 1.442695, %v875_v3 }
 0x2ef   : > { %v887_v7 = vmul.f32 1.442695, %v874_v4 }
 0x2f0   : > { %2184 = vpow2.f32 %v889_v6 }
 0x2f1   : > { %2186 = vpow2.f32 %v887_v7 }
 0x2f2   : > { %v2181_v8 = vpop.eup %2180 }
 0x2f3   : > { %v2183_v9 = vpop.eup %2182  ;;  %v868_v10 = vpop.xlane.xlu1 %867  ;;  %v905_v12 = vsel %vm844_vm2, %v2181_v8, 0.0 }
 0x2f4   : > { %v876_v13 = vsub.f32 %v839_v35, %v868_v10  ;;  %906 = vadd.xlane.f32.xlu0 %v905_v12  ;;  %v902_v14 = vsel %vm844_vm2, %v2183_v9, 0.0 }
 0x2f5   : > { %903 = vadd.xlane.f32.xlu1 %v902_v14 }
 0x2f6   : > { %v891_v15 = vmul.f32 1.442695, %v876_v13 }
 0x2f8   : > { %2188 = vpow2.f32 %v891_v15 }
 0x2fa   : > { %v2714_v16 = vpop.eup %2184 }
 0x2fb   : > { %v2716_v17 = vpop.eup %2186  ;;  %v911_v18 = vsel %vm844_vm2, %v2714_v16, 0.0 }
 0x2fc   : > { %912 = vadd.xlane.f32.xlu0 %v911_v18  ;;  %v908_v19 = vsel %vm844_vm2, %v2716_v17, 0.0 }
 0x2fd   : > { %909 = vadd.xlane.f32.xlu1 %v908_v19 }
 0x302   : > { %v2722_v20 = vpop.eup %2188 }
 0x303   : > { %v914_v21 = vsel %vm844_vm2, %v2722_v20, 0.0 }
 0x304   : > { %915 = vadd.xlane.f32.xlu1 %v914_v21 }
 0x371   : > { %v895_v22 = vpop.xlane.xlu0 %894 }
 0x372   : > { %2190 = vrcp.f32 %v895_v22 }
 0x379   : > { %v898_v23 = vpop.xlane.xlu1 %897 }
 0x37a   : > { %v901_v24 = vpop.xlane.xlu0 %900  ;;  %2192 = vrcp.f32 %v898_v23 }
 0x37b   : > { %2194 = vrcp.f32 %v901_v24 }
 0x37c   : > { %v2191_v25 = vpop.eup %2190 }
 0x37d   : > { %v925_v26 = vmul.f32 %v2191_v25, %v2175_v56 }
 0x37f   : > { %v933_v27 = vsel %vm844_vm2, %v925_v26, 0.0 }
 0x380   : > { %v934_v28 = vrot.slane %v933_v27, 4 }
 0x381   : > { %v907_v29 = vpop.xlane.xlu0 %906 }
 0x382   : > { %v935_v30 = vadd.f32 %v934_v28, %v933_v27  ;;  %2196 = vrcp.f32 %v907_v29  ;;  %v904_v31 = vpop.xlane.xlu1 %903 }
 0x383   : > { %2198 = vrcp.f32 %v904_v31 }
 0x384   : > { %v2193_v32 = vpop.eup %2192  ;;  %v936_v34 = vrot.slane %v935_v30, 2 }
 0x385   : > { %v2195_v35 = vpop.eup %2194  ;;  %v926_v36 = vmul.f32 %v2193_v32, %v2177_v0 }
 0x386   : > { %v927_v37 = vmul.f32 %v2195_v35, %v2179_v1  ;;  %v937_v39 = vadd.f32 %v936_v34, %v935_v30 }
 0x387   : > { %v940_v40 = vsel %vm844_vm2, %v926_v36, 0.0 }
 0x388   : > { %v947_v42 = vsel %vm844_vm2, %v927_v37, 0.0  ;;  %v941_v43 = vrot.slane %v940_v40, 4  ;;  %v938_v45 = vrot.slane %v937_v39, 1 }
 0x389   : > { %v948_v48 = vrot.slane %v947_v42, 4  ;;  %v913_v49 = vpop.xlane.xlu0 %912 }
 0x38a   : > { %v942_v50 = vadd.f32 %v941_v43, %v940_v40  ;;  %2200 = vrcp.f32 %v913_v49  ;;  %v910_v51 = vpop.xlane.xlu1 %909  ;;  %v939_v52 = vadd.f32 %v938_v45, %v937_v39  ;;  %v1573_v43 = vld [vmem:[#allocation8] sm:$0xff]  ;;  %v1574_v45 = vld [vmem:[#allocation8 + $0x8] sm:$0xff] }
 0x38b   : > { %v949_v54 = vadd.f32 %v948_v48, %v947_v42  ;;  %2202 = vrcp.f32 %v910_v51  ;;  %v2409_v48 = vmov 0.0|0.0   ;;  %v2048_v49 = vpack.c.bf16 %v1574_v45, %v1573_v43  ;;  %v1576_v51 = vld [vmem:[#allocation8 + $0x18] sm:$0xff] }
 0x38c   : > { %v2197_v56 = vpop.eup %2196  ;;  %1975 = vmatmul.mubr.msk.f32.vlgmr.msra.gmra.mrb[20].mxu0 %vm844_vm2, %v939_v52  ;;  %v943_v53 = vrot.slane %v942_v50, 2 }
 0x38d   : > { %v2199_v57 = vpop.eup %2198  ;;  %v929_v58 = vmul.f32 %v2197_v56, %v2181_v8  ;;  %1983 = vmatpush3.msra.mxu0 %v2668_v33  ;;  %1984 = vmatprep.mubr.msk.f32.mxu0 %vm2408_vm1, %v2407_v11  ;;  %v950_v59 = vrot.slane %v949_v54, 2  ;;  %v1579_v56 = vld [vmem:[#allocation8 + $0x30] sm:$0xff] }
 0x38e   : > { %v928_v60 = vmul.f32 %v2199_v57, %v2183_v9  ;;  %1992 = vmatprep.subr.mxu0 %v2407_v11  ;;  %v944_v61 = vadd.f32 %v943_v53, %v942_v50  ;;  %v1575_v50 = vld [vmem:[#allocation8 + $0x10] sm:$0xff]  ;;  %v1580_v53 = vld [vmem:[#allocation8 + $0x38] sm:$0xff] }
 0x38f   : > { %v961_v55 = vsel %vm844_vm2, %v929_v58, 0.0  ;;  %v951_v0 = vadd.f32 %v950_v59, %v949_v54  ;;  %v2051_v52 = vpack.c.bf16 %v1576_v51, %v1575_v50  ;;  %v1578_v54 = vld [vmem:[#allocation8 + $0x28] sm:$0xff]  ;;  %v2057_v57 = vpack.c.bf16 %v1580_v53, %v1579_v56  ;;  %v1581_v58 = vld [vmem:[#allocation8 + $0x40] sm:$0xff] }
 0x390   : > { %v962_v1 = vrot.slane %v961_v55, 4  ;;  %v954_v62 = vsel %vm844_vm2, %v928_v60, 0.0  ;;  %v945_v63 = vrot.slane %v944_v61, 1  ;;  %v1582_v59 = vld [vmem:[#allocation8 + $0x48] sm:$0xff] }
 0x391   : > { %v955_v2 = vrot.slane %v954_v62, 4  ;;  %v916_v3 = vpop.xlane.xlu1 %915  ;;  %v952_v4 = vrot.slane %v951_v0, 1  ;;  %v2060_v60 = vpack.c.bf16 %v1582_v59, %v1581_v58 }
 0x392   : > { %v963_v5 = vadd.f32 %v962_v1, %v961_v55  ;;  %2204 = vrcp.f32 %v916_v3  ;;  %v946_v33 = vadd.f32 %v945_v63, %v944_v61  ;;  %v1583_v61 = vld [vmem:[#allocation8 + $0x50] sm:$0xff]  ;;  %v1584_v55 = vld [vmem:[#allocation8 + $0x58] sm:$0xff]  ;;  %v1585_v1 = vld [vmem:[#allocation8 + $0x60] sm:$0xff] }
 0x393   : > { %v956_v6 = vadd.f32 %v955_v2, %v954_v62  ;;  %v953_v7 = vadd.f32 %v952_v4, %v951_v0  ;;  %v2063_v0 = vpack.c.bf16 %v1584_v55, %v1583_v61  ;;  %v1586_v62 = vld [vmem:[#allocation8 + $0x68] sm:$0xff]  ;;  %v1587_v2 = vld [vmem:[#allocation8 + $0x70] sm:$0xff]  ;;  %v1588_v3 = vld [vmem:[#allocation8 + $0x78] sm:$0xff] }
 0x394   : > { %v2201_v8 = vpop.eup %2200  ;;  %1980 = vmatmul.mubr.msk.f32.vlgmr.msra.gmra.mrb[36].mxu1 %vm844_vm2, %v946_v33  ;;  %v964_v9 = vrot.slane %v963_v5, 2  ;;  %v2066_v63 = vpack.c.bf16 %v1586_v62, %v1585_v1  ;;  %v2069_v4 = vpack.c.bf16 %v1588_v3, %v1587_v2 }
 0x395   : > { %v2203_v10 = vpop.eup %2202  ;;  %v931_v12 = vmul.f32 %v2201_v8, %v2714_v16  ;;  %1985 = vmatmul.mubr.msk.f32.vlgmr.msra.gmra.mrb[22].mxu0 %vm844_vm2, %v953_v7  ;;  %1988 = vmatpush3.msra.mxu1 %v2670_v38  ;;  %v957_v13 = vrot.slane %v956_v6, 2 }
 0x396   : > { %v930_v14 = vmul.f32 %v2203_v10, %v2716_v17  ;;  %1993 = vmatpush3.msra.mxu0 %v2680_v44  ;;  %1989 = vmatprep.mubr.msk.f32.mxu1 %vm2408_vm1, %v2407_v11  ;;  %v965_v15 = vadd.f32 %v964_v9, %v963_v5 }
 0x397   : > { %v975_v18 = vsel %vm844_vm2, %v931_v12, 0.0  ;;  %1994 = vmatprep.mubr.msk.f32.mxu0 %vm2408_vm1, %v2407_v11  ;;  %1997 = vmatprep.subr.mxu1 %v2407_v11  ;;  %v958_v16 = vadd.f32 %v957_v13, %v956_v6 }
 0x398   : > { %v976_v19 = vrot.slane %v975_v18, 4  ;;  %v968_v38 = vsel %vm844_vm2, %v930_v14, 0.0  ;;  %2002 = vmatprep.subr.mxu0 %v2407_v11  ;;  %v966_v17 = vrot.slane %v965_v15, 1 }
 0x399   : > { %v969_v21 = vrot.slane %v968_v38, 4  ;;  %v959_v44 = vrot.slane %v958_v16, 1 }
 0x39a   : > { %v977_v22 = vadd.f32 %v976_v19, %v975_v18  ;;  %v967_v23 = vadd.f32 %v966_v17, %v965_v15 }
 0x39b   : > { %v970_v24 = vadd.f32 %v969_v21, %v968_v38  ;;  %v960_v25 = vadd.f32 %v959_v44, %v958_v16 }
 0x39c   : > { %v2205_v26 = vpop.eup %2204  ;;  %v978_v27 = vrot.slane %v977_v22, 2  ;;  %1995 = vmatmul.mubr.msk.f32.vlgmr.msra.gmra.mrb[24].mxu0 %vm844_vm2, %v967_v23 }
 0x39d   : > { %v932_v28 = vmul.f32 %v2205_v26, %v2722_v20  ;;  %1990 = vmatmul.mubr.msk.f32.vlgmr.msra.gmra.mrb[38].mxu1 %vm844_vm2, %v960_v25  ;;  %2003 = vmatpush3.msra.mxu0 %v2678_v41  ;;  %v971_v29 = vrot.slane %v970_v24, 2 }
 0x39e   : > { %1998 = vmatpush3.msra.mxu1 %v2684_v47  ;;  %1999 = vmatprep.mubr.msk.f32.mxu1 %vm2408_vm1, %v2407_v11  ;;  %v979_v30 = vadd.f32 %v978_v27, %v977_v22 }
 0x39f   : > { %v982_v31 = vsel %vm844_vm2, %v932_v28, 0.0  ;;  %2004 = vmatprep.mubr.msk.f32.mxu0 %vm2408_vm1, %v2407_v11  ;;  %2007 = vmatprep.subr.mxu1 %v2407_v11  ;;  %v972_v32 = vadd.f32 %v971_v29, %v970_v24 }
 0x3a0   : > { %v983_v20 = vrot.slane %v982_v31, 4  ;;  %v980_v34 = vrot.slane %v979_v30, 1  ;;  %2047 = vmatprep.subr.bf16.mxu0 %v2409_v48 }
 0x3a1   : > { %v973_v35 = vrot.slane %v972_v32, 1 }
 0x3a2   : > { %v984_v36 = vadd.f32 %v983_v20, %v982_v31  ;;  %v981_v41 = vadd.f32 %v980_v34, %v979_v30  ;;  %v1851_v34 = vld [vmem:[%s2825_s4] ss:$0 sm:$0xff] }
 0x3a3   : > { %v974_v37 = vadd.f32 %v973_v35, %v972_v32 }
 0x3a4   : > { %v985_v39 = vrot.slane %v984_v36, 2  ;;  %2005 = vmatmul.mubr.msk.f32.vlgmr.msra.gmra.mrb[26].mxu0 %vm844_vm2, %v981_v41 }
 0x3a5   : > { %2000 = vmatmul.mubr.msk.f32.vlgmr.msra.gmra.mrb[40].mxu1 %vm844_vm2, %v974_v37  ;;  %2044 = vmatprep.mubr.msk.f32.mxu0 %vm2408_vm1, %v2407_v11 }
 0x3a6   : > { %2008 = vmatpush3.msra.mxu1 %v2682_v46  ;;  %2009 = vmatprep.mubr.msk.f32.mxu1 %vm2408_vm1, %v2407_v11  ;;  %v986_v47 = vadd.f32 %v985_v39, %v984_v36  ;;  %v1577_v46 = vld [vmem:[#allocation8 + $0x20] sm:$0xff] }
 0x3a7   : > { %2049 = vmatpush3.bf16.msra.mxu0 %v2048_v49  ;;  %v2054_v11 = vpack.c.bf16 %v1578_v54, %v1577_v46 }
 0x3a8   : > { %v987_v40 = vrot.slane %v986_v47, 1  ;;  %2050 = vmatprep.subr.bf16.mxu0 %v2409_v48 }
 0x3aa   : > { %v988_v42 = vadd.f32 %v987_v40, %v986_v47 }
 0x3ab   : > { %2052 = vmatpush3.bf16.msra.mxu0 %v2051_v52 }
 0x3ac   : > { %2010 = vmatmul.mubr.msk.f32.vlgmr.msra.gmra.mrb[42].mxu1 %vm844_vm2, %v988_v42  ;;  %2053 = vmatprep.subr.bf16.mxu0 %v2409_v48 }
 0x3af   : > { %2055 = vmatpush3.bf16.msra.mxu0 %v2054_v11 }
 0x3b0   : > { %2056 = vmatprep.subr.bf16.mxu0 %v2409_v48 }
 0x3b3   : > { %2058 = vmatpush3.bf16.msra.mxu0 %v2057_v57 }
 0x3b4   : > { %2059 = vmatprep.subr.bf16.mxu0 %v2409_v48 }
 0x3b7   : > { %2061 = vmatpush3.bf16.msra.mxu0 %v2060_v60 }
 0x3b8   : > { %2062 = vmatprep.subr.bf16.mxu0 %v2409_v48 }
 0x3bb   : > { %2064 = vmatpush3.bf16.msra.mxu0 %v2063_v0 }
 0x3bc   : > { %2065 = vmatprep.subr.bf16.mxu0 %v2409_v48 }
 0x3bf   : > { %2067 = vmatpush3.bf16.msra.mxu0 %v2066_v63 }
 0x3c0   : > { %2068 = vmatprep.subr.bf16.mxu0 %v2409_v48 }
 0x3c3   : > { %2070 = vmatpush3.bf16.msra.mxu0 %v2069_v4 }
 0x45f   : > { %v1058_v5 = vpop.f32.mrb[20].mxu0 }
 0x460   : > { %v1976_v33 = vpop.f32.mrb[21].mxu0 }
 0x467   : > { %v1131_v6 = vpop.f32.mrb[36].mxu1 }
 0x468   : > { %v1604_v7 = vrot.slane %v1131_v6, 7  ;;  %v1204_v8 = vpop.f32.mrb[22].mxu0  ;;  %v1981_v9 = vpop.f32.mrb[37].mxu1 }
 0x469   : > { %v1607_v10 = vrot.slane %v1204_v8, 6  ;;  %v1986_v12 = vpop.f32.mrb[23].mxu0 }
 0x46a   : > { %v1606_v13 = vsel %vm1605_vm3, %v1604_v7, %v1058_v5 }
 0x46b   : > { %v1609_v14 = vsel %vm1608_vm4, %v1607_v10, %v1606_v13 }
 0x46f   : > { %v1350_v15 = vpop.f32.mrb[24].mxu0 }
 0x470   : > { %v1277_v18 = vpop.f32.mrb[38].mxu1  ;;  %v1613_v16 = vrot.slane %v1350_v15, 4  ;;  %v1996_v19 = vpop.f32.mrb[25].mxu0 }
 0x471   : > { %v1610_v38 = vrot.slane %v1277_v18, 5  ;;  %v1991_v17 = vpop.f32.mrb[39].mxu1 }
 0x473   : > { %v1612_v21 = vsel %vm1611_vm5, %v1610_v38, %v1609_v14 }
 0x474   : > { %v1615_v44 = vsel %vm1614_vm6, %v1613_v16, %v1612_v21 }
 0x477   : > { %v1496_v22 = vpop.f32.mrb[26].mxu0 }
 0x478   : > { %v1423_v23 = vpop.f32.mrb[40].mxu1  ;;  %v1619_v24 = vrot.slane %v1496_v22, 2  ;;  %v2006_v25 = vpop.f32.mrb[27].mxu0 }
 0x479   : > { %v1616_v26 = vrot.slane %v1423_v23, 3  ;;  %v2001_v27 = vpop.f32.mrb[41].mxu1 }
 0x47b   : > { %v1618_v28 = vsel %vm1617_vm7, %v1616_v26, %v1615_v44 }
 0x47c   : > { %v1621_v29 = vsel %vm1620_vm8, %v1619_v24, %v1618_v28 }
 0x47f   : > { %v1569_v30 = vpop.f32.mrb[42].mxu1 }
 0x480   : > { %v1622_v31 = vrot.slane %v1569_v30, 1  ;;  %v2011_v32 = vpop.f32.mrb[43].mxu1 }
 0x482   : > { %v1624_v20 = vsel %vm1623_vm9, %v1622_v31, %v1621_v29 }
 0x483   : > { %2045 = vmatmul.mubr.f32.vlgmr.msra.gmra.mrb[28].mxu0 %v1624_v20 }
 0x556   : > { %v1692_v35 = vpop.f32.mrb[28].mxu0 }
 0x557   : > { %v1693_v36 = vadd.f32 %v1851_v34, %v1692_v35  ;;  %v2046_v41 = vpop.f32.mrb[29].mxu0 }
 0x559   : > { %1696 = vst [vmem:[%s284_s30] sm:$0xff] %v1693_v36 }
 0x55a   : > { %2333 = shalt.err (!%p2330_p13)
}
 0x55b   : > { %s2334_s17 = scalar_lea.hbm %s2777_s10, 128  ;;  %s2338_s24 = scalar_lea.hbm %s2826_s5, 256 }
 0x55c   : > { %p2335_p0 = scmp.ne.s32.totalorder %s2777_s10, %s2334_s17  ;;  %p2339_p9 = scmp.lt.u32.totalorder %s2777_s10, %s2826_s5 }
 0x55d   : > { %p2340_p12 = scmp.lt.u32.totalorder %s2338_s24, %s2334_s17  ;;  %p2342_p1 = scmp.lt.u32.totalorder %s2334_s17, %s2777_s10 }
 0x55e   : > { %p2336_p5 = pnand %p2335_p0, %p2579_p6 }
 0x55f   : > { %p2341_p2 = por %p2340_p12, %p2339_p9 }
 0x560   : > { %p2337_p11 = pneg %p2336_p5 }
 0x561   : > { %p2343_p4 = por %p2342_p1, %p2341_p2 }
 0x563   : > { %p2344_p8 = pnand %p2343_p4, %p2337_p11 }
 0x565   : > { %2347 = shalt.err (!%p2344_p8)
}
 0x566   : > { %2089 = dma.vmem_to_hbm [thread:$0]  (%p2579_p6), %s2779_s14, 128, %s2777_s10, %s1698_s12  }
 0x567 PF: > { %s1723_s13 = sand.u32 1, %s2382_s18   ;;  %p2844_p3 = scmp.ne.s32.totalorder %s2831_s25, 0 }
 0x568   : > { %p2845_p7 = scmp.ge.s32.totalorder %s2394_s21, 2  ;;  %s1724_s30 = scalar_lea.sflag [#allocation4], %s1723_s13 }
 0x56a   : > { %p2106_p10 = pnand %p2845_p7, %p2844_p3 }
 0x56c   : > { %2377 = dma.done.wait (!%p2106_p10), %s1724_s30, 128  }
 0x56d   : > { %2379 = vsyncadd (!%p2106_p10), %s1724_s30, 4294967168  ;;  %p20_p13 = scmp.ge.s32.totalorder %s2565_s16, 4   ;;  %s2846_s18 = smov %s2386_s19 }
 0x56e   : > { %s2847_s19 = smov %s2390_s20  ;;  %s2848_s20 = smov %s2575_s27 }
 0x56f   : > { %s2849_s21 = smov %s2565_s16  ;;  %22 = sbr.rel (!%p20_p13) target bundleno = 7 (0x7), region = 97 }
 0x576   :  { %1729 = vsyncpa [#allocation3], 1 }
 0x577   :  { %1731 = vsyncpa [#allocation3 + $0x1], 1 }
 0x578   :  { %1732 = vsyncpa [#allocation6], 1 }
 0x579   :  { %1733 = vsyncpa [#allocation9], 1 }
 0x57a   :  { %1734 = vsyncpa [#allocation4], 1 }
 0x57b   :  { %1736 = vsyncpa [#allocation4 + $0x1], 1 }

</bundles_post_ra>
